<compile_context>
chip_gen: v7x
topology: tpu7x:2x2x1
jax: 0.10.0
libtpu: 0.0.40
codegen_flags: <defaults>
</compile_context>

<pallas_src>
from functools import partial

import numpy as np
import jax
import jax.numpy as jnp
from jax.experimental import pallas as pl
from jax.experimental.pallas import tpu as pltpu

POOL_SIZES = (1, 2, 3, 6)
NB = len(POOL_SIZES)
SP = 64                      # sum(s*s) = 50 packed pooled cells, padded to 64


# --------------------------------------------------------------------------
# Host-side operator construction
# --------------------------------------------------------------------------
def adaptive_pool_matrix(out_size, in_size):
    """Row-stochastic matrix implementing nn.AdaptiveAvgPool semantics (1D)."""
    P = np.zeros((out_size, in_size), np.float32)
    for i in range(out_size):
        start = (i * in_size) // out_size
        end = -((-(i + 1) * in_size) // out_size)          # ceil((i+1)*in/out)
        P[i, start:end] = 1.0 / (end - start)
    return P


def bilinear_matrix(out_size, in_size):
    """Matrix implementing F.interpolate(mode='bilinear', align_corners=False) along one axis."""
    L = np.zeros((out_size, in_size), np.float32)
    scale = in_size / out_size
    for i in range(out_size):
        src = max((i + 0.5) * scale - 0.5, 0.0)            # PyTorch clamps negative src to 0
        i0 = min(int(np.floor(src)), in_size - 1)
        i1 = min(i0 + 1, in_size - 1)
        l1 = src - i0
        L[i, i0] += 1.0 - l1
        L[i, i1] += l1
    return L


def build_stacked_spatial_operators(H, W):
    """Pack all branches into one pool operator (transposed) and one upsample operator (transposed)."""
    # TODO(synk): operator construction mirrors torch adaptive_avg_pool2d /
    # interpolate(align_corners=False) semantics but is only cross-checked here
    # against an in-file JAX reference, not against real torch outputs.
    HW = H * W
    ppT = np.zeros((HW, SP), np.float32)    # x (C,HW) @ ppT -> pooled^T (C,SP)
    llT = np.zeros((SP, HW), np.float32)    # z^T (4C,SP) @ llT -> up^T (4C,HW)
    off = 0
    for s in POOL_SIZES:
        Pk = np.kron(adaptive_pool_matrix(s, H), adaptive_pool_matrix(s, W))   # (s*s, HW)
        Lk = np.kron(bilinear_matrix(H, s), bilinear_matrix(W, s))             # (HW, s*s)
        ppT[:, off:off + s * s] = Pk.T
        llT[off:off + s * s, :] = Lk.T
        off += s * s
    return ppT, llT                          # padded rows/cols stay zero -> never reach output


def build_branch_mask(C):
    """0/1 block-diagonal mask: (branch-out-channel, packed pooled cell)."""
    mask = np.zeros((NB * C, SP), np.float32)
    off = 0
    for k, s in enumerate(POOL_SIZES):
        mask[k * C:(k + 1) * C, off:off + s * s] = 1.0
        off += s * s
    return mask


# --------------------------------------------------------------------------
# Kernels
# --------------------------------------------------------------------------
def _pool_kernel(x_ref, ppT_ref, wT_ref, shift_ref, mask_ref, z_ref, acc_ref, *, hw, thw):
    # x_ref     : (1, C, THW)   HW tile of the input
    # ppT_ref   : (THW, SP)     matching rows of the stacked adaptive-pool operator
    # wT_ref    : (4C, C)       stacked 1x1-conv weights with BN scale folded in
    # shift_ref : (4C, SP)      folded conv-bias/BN shift (pre-masked per branch block)
    # mask_ref  : (4C, SP)      0/1 block-diagonal branch mask
    # z_ref     : (1, 4C, SP)   output: branch activations for this batch element
    # acc_ref   : (C, SP)       pooled^T accumulator (VMEM scratch, persists over t)
    t = pl.program_id(1)

    @pl.when(t == 0)
    def _():
        acc_ref[...] = jnp.zeros_like(acc_ref)

    xt = x_ref[0]                                                   # (C, THW)
    if hw % thw != 0:                                               # static: mask the partial edge tile
        col = t * thw + jax.lax.broadcasted_iota(jnp.int32, xt.shape, 1)
        xt = jnp.where(col < hw, xt, 0.0)
    acc_ref[...] += jnp.dot(xt, ppT_ref[...], preferred_element_type=jnp.float32)

    @pl.when(t == pl.num_programs(1) - 1)
    def _():
        zT = jnp.dot(wT_ref[...], acc_ref[...], preferred_element_type=jnp.float32)
        zT = jnp.maximum(zT + shift_ref[...], 0.0)                  # ReLU twice == once
        z_ref[0] = jnp.where(mask_ref[...] != 0, zT, 0.0)           # kill cross-branch garbage (NaN-safe)


def _upsample_kernel(x_ref, z_ref, llT_ref, o_ref):
    # x_ref   : (1, C, THW)     HW tile of the input (identity branch)
    # z_ref   : (1, 4C, SP)     branch activations for this batch element
    # llT_ref : (SP, THW)       matching columns of the stacked bilinear-upsample operator
    # o_ref   : (1, 5C, THW)    output tile (identity || 4 branches), lane dim = THW
    C = x_ref.shape[1]
    o_ref[0, 0:C, :] = x_ref[0].astype(o_ref.dtype)                 # identity branch
    upT = jnp.dot(z_ref[0], llT_ref[...], preferred_element_type=jnp.float32)
    o_ref[0, C:, :] = upT.astype(o_ref.dtype)


# --------------------------------------------------------------------------
# Wrapper
# --------------------------------------------------------------------------
def _vmem_budget_bytes():
    try:
        cap = int(pltpu.get_tpu_info().vmem_capacity_bytes)
    except Exception:
        cap = 64 * 1024 * 1024            # assume the smallest per-core VMEM (v7x)
    return (cap * 3) // 4                 # leave headroom for compiler scratch / spills


def _vmem_limit(needed_bytes, budget):
    return int(min(budget, max(32 * 1024 * 1024, 2 * needed_bytes + (4 << 20))))


def _choose_tile_hw(HW, C, tile_hw, budget):
    """Largest lane-dense HW tile (multiple of 128) whose blocks fit the VMEM budget."""
    if HW <= tile_hw:
        return HW                                   # single tile == full array dim (always legal)
    thw = max(128, (tile_hw // 128) * 128)

    def footprint(t):                               # double-buffered f32 blocks of the upsample pass
        per = C * t + NB * C * SP + SP * t + (NB + 1) * C * t
        return 8 * per

    while thw > 128 and footprint(thw) > budget:
        thw = max(128, ((thw // 2) // 128) * 128)
    return thw


def ppm_forward(x_nchw, w_eff, shift, *, tile_hw=None, out_dtype=None):
    """PPM forward.

    x_nchw : (N, C, H, W) input features
    w_eff  : (NB, C, C)  per-branch 1x1 conv weights with eval-mode BN scale folded in
    shift  : (NB, C)     folded conv-bias / BN shift
    """
    N, C, H, W = x_nchw.shape
    HW = H * W
    out_dtype = x_nchw.dtype if out_dtype is None else out_dtype
    # TODO(synk): bf16 operand path (would halve the dominant output write stream
    # on v6e/v7x) is not wired in; computation stays f32, out_dtype is configurable.
    # TODO(synk): assumes the 1x1 conv is square (C_out == C_in) as in this module.

    budget = _vmem_budget_bytes()
    if tile_hw is None:
        tile_hw = 1024 if budget >= (64 << 20) else 512    # bigger tiles on 128-MiB-VMEM parts
    THW = _choose_tile_hw(HW, C, tile_hw, budget)
    T = pl.cdiv(HW, THW)
    HW_pad = T * THW          # spatial operators are zero-padded to a whole number of tiles

    ppT_np, llT_np = build_stacked_spatial_operators(H, W)
    ppT = jnp.asarray(np.pad(ppT_np, ((0, HW_pad - HW), (0, 0))))   # (HW_pad, SP)
    llT = jnp.asarray(np.pad(llT_np, ((0, 0), (0, HW_pad - HW))))   # (SP, HW_pad)
    maskT = jnp.asarray(build_branch_mask(C))                       # (4C, SP)
    wT = jnp.asarray(w_eff).reshape(NB * C, C)                      # (4C, C)
    shift_masked = maskT * jnp.asarray(shift).reshape(NB * C, 1)    # (4C, SP)

    x_flat = x_nchw.reshape(N, C, HW)                # pure reshape, NCHW kept end-to-end

    # ---- pass 1: adaptive avg-pool + 1x1 conv + folded BN + ReLU (tiny) ----
    pool_vmem = 8 * (C * THW + THW * SP + NB * C * C + 3 * NB * C * SP) + 4 * C * SP
    pool_flops = N * (2 * C * HW * SP + 2 * NB * C * C * SP)
    pool_bytes = 4 * (N * C * HW + HW_pad * SP + NB * C * C
                      + 2 * NB * C * SP + N * NB * C * SP)
    zT = pl.pallas_call(
        partial(_pool_kernel, hw=HW, thw=THW),
        out_shape=jax.ShapeDtypeStruct((N, NB * C, SP), jnp.float32),
        grid_spec=pltpu.PrefetchScalarGridSpec(
            num_scalar_prefetch=0,
            grid=(N, T),
            in_specs=[
                pl.BlockSpec((1, C, THW), lambda b, t: (b, 0, t)),
                pl.BlockSpec((THW, SP), lambda b, t: (t, 0)),
                pl.BlockSpec((NB * C, C), lambda b, t: (0, 0)),
                pl.BlockSpec((NB * C, SP), lambda b, t: (0, 0)),
                pl.BlockSpec((NB * C, SP), lambda b, t: (0, 0)),
            ],
            out_specs=pl.BlockSpec((1, NB * C, SP), lambda b, t: (b, 0, 0)),
            scratch_shapes=[pltpu.VMEM((C, SP), jnp.float32)],
        ),
        compiler_params=pltpu.CompilerParams(
            dimension_semantics=("parallel", "arbitrary"),
            vmem_limit_bytes=_vmem_limit(pool_vmem, budget)),
        cost_estimate=pl.CostEstimate(flops=pool_flops, transcendentals=0,
                                      bytes_accessed=pool_bytes),
    )(x_flat, ppT, wT, shift_masked, maskT)

    # ---- pass 2: identity copy + stacked bilinear upsample (dominant traffic) ----
    up_vmem = 8 * (C * THW + NB * C * SP + SP * THW + (NB + 1) * C * THW)
    up_flops = N * 2 * NB * C * SP * HW
    up_bytes = int(4 * (N * C * HW + N * NB * C * SP + SP * HW_pad)
                   + np.dtype(out_dtype).itemsize * N * (NB + 1) * C * HW)
    out = pl.pallas_call(
        _upsample_kernel,
        out_shape=jax.ShapeDtypeStruct((N, (NB + 1) * C, HW), out_dtype),
        grid_spec=pltpu.PrefetchScalarGridSpec(
            num_scalar_prefetch=0,
            grid=(N, T),
            in_specs=[
                pl.BlockSpec((1, C, THW), lambda b, t: (b, 0, t)),
                pl.BlockSpec((1, NB * C, SP), lambda b, t: (b, 0, 0)),
                pl.BlockSpec((SP, THW), lambda b, t: (0, t)),
            ],
            out_specs=pl.BlockSpec((1, (NB + 1) * C, THW), lambda b, t: (b, 0, t)),
        ),
        compiler_params=pltpu.CompilerParams(
            dimension_semantics=("parallel", "parallel"),   # megacore-friendly on multi-core parts
            vmem_limit_bytes=_vmem_limit(up_vmem, budget)),
        cost_estimate=pl.CostEstimate(flops=up_flops, transcendentals=0,
                                      bytes_accessed=up_bytes),
    )(x_flat, zT, llT)
    return out.reshape(N, (NB + 1) * C, H, W)        # pure reshape, no transpose


# --------------------------------------------------------------------------
# Self-test
# --------------------------------------------------------------------------
if __name__ == "__main__":
    N, C, H, W = 2, 4, 16, 16
    key = jax.random.PRNGKey(0)
    kx, kw, kb, kg, kbe, km, kv = jax.random.split(key, 7)

    x = jax.random.normal(kx, (N, C, H, W), jnp.float32)

    # Synthetic per-branch ConvModule parameters (Conv 1x1 + SyncBatchNorm + ReLU).
    conv_w = jax.random.normal(kw, (NB, C, C), jnp.float32) * 0.3      # (branch, out, in)
    conv_b = jax.random.normal(kb, (NB, C), jnp.float32) * 0.1
    gamma = 1.0 + 0.1 * jax.random.normal(kg, (NB, C), jnp.float32)
    beta = 0.1 * jax.random.normal(kbe, (NB, C), jnp.float32)
    run_mean = 0.1 * jax.random.normal(km, (NB, C), jnp.float32)
    run_var = jax.random.uniform(kv, (NB, C), jnp.float32, 0.5, 1.5)
    eps = 1e-5

    # TODO(synk): SyncBatchNorm is folded in eval mode (running stats); training-mode
    # cross-replica batch statistics are not reproduced here.
    scale = gamma / jnp.sqrt(run_var + eps)                            # (NB, C)
    W_eff = conv_w * scale[:, :, None]                                 # (NB, C_out, C_in)
    shift = scale * conv_b + beta - run_mean * scale                   # (NB, C)

    out = ppm_forward(x, W_eff, shift)
    out = jax.block_until_ready(out)
    assert out.shape == (N, (NB + 1) * C, H, W), out.shape

    # Plain-JAX per-branch (un-fused) reference for a correctness cross-check.
    x_flat = x.reshape(N, C, H * W)
    feats = [x_flat]
    for k, s in enumerate(POOL_SIZES):
        Pk = jnp.asarray(np.kron(adaptive_pool_matrix(s, H), adaptive_pool_matrix(s, W)))
        Lk = jnp.asarray(np.kron(bilinear_matrix(H, s), bilinear_matrix(W, s)))
        pooled = jnp.einsum('sp,ncp->ncs', Pk, x_flat)
        z = jnp.maximum(jnp.einsum('oc,ncs->nos', W_eff[k], pooled)
                        + shift[k][None, :, None], 0.0)
        feats.append(jnp.einsum('ps,nos->nop', Lk, z))
    ref = jnp.concatenate(feats, axis=1).reshape(N, (NB + 1) * C, H, W)

    assert np.allclose(np.asarray(out), np.asarray(ref), rtol=1e-4, atol=1e-4)
    print("KERNEL_OK")
</pallas_src>

<mosaic_0001>
module attributes {stable_mosaic.version = 11 : i64} {
  func.func @_pool_kernel(%arg0: i32, %arg1: i32, %arg2: memref<1x4x256xf32, #tpu.memory_space<vmem>>, %arg3: memref<256x64xf32, #tpu.memory_space<vmem>>, %arg4: memref<16x4xf32, #tpu.memory_space<vmem>>, %arg5: memref<16x64xf32, #tpu.memory_space<vmem>>, %arg6: memref<16x64xf32, #tpu.memory_space<vmem>>, %arg7: memref<1x16x64xf32, #tpu.memory_space<vmem>>, %arg8: memref<4x64xf32, #tpu.memory_space<vmem>>) attributes {dimension_semantics = [#tpu.dimension_semantics<parallel>, #tpu.dimension_semantics<arbitrary>], iteration_bounds = array<i64: 2, 1>, scalar_prefetch = 0 : i64, scratch_operands = 1 : i64, tpu.core_type = #tpu.core_type<tc>, window_params = [{transform_indices = @transform_0, window_bounds = array<i64: 1, 4, 256>}, {transform_indices = @transform_1, window_bounds = array<i64: 256, 64>}, {pipeline_mode = #tpu.pipeline_mode<synchronous>, transform_indices = @transform_2, window_bounds = array<i64: 16, 4>}, {pipeline_mode = #tpu.pipeline_mode<synchronous>, transform_indices = @transform_3, window_bounds = array<i64: 16, 64>}, {pipeline_mode = #tpu.pipeline_mode<synchronous>, transform_indices = @transform_4, window_bounds = array<i64: 16, 64>}, {transform_indices = @transform_5, window_bounds = array<i64: 1, 16, 64>}]} {
    %c0_i32 = arith.constant 0 : i32
    %0 = arith.cmpi eq, %arg1, %c0_i32 : i32
    %1 = arith.extui %0 : i1 to i32
    %c0_i32_0 = arith.constant 0 : i32
    %2 = arith.cmpi ne, %1, %c0_i32_0 : i32
    scf.if %2 {
      %cst_11 = arith.constant 0.000000e+00 : f32
      %13 = vector.broadcast %cst_11 : f32 to vector<4x64xf32>
      %c0_12 = arith.constant 0 : index
      %c0_13 = arith.constant 0 : index
      %14 = vector.load %arg8[%c0_12, %c0_13] : memref<4x64xf32, #tpu.memory_space<vmem>>, vector<4x64xf32>
      tpu.vector_store %arg8[%c0_12, %c0_13], %13 {strides = array<i32>} : memref<4x64xf32, #tpu.memory_space<vmem>>, vector<4x64xf32>,
    } else {
    }
    %c0 = arith.constant 0 : index
    %c0_1 = arith.constant 0 : index
    %c0_2 = arith.constant 0 : index
    %3 = vector.load %arg2[%c0, %c0_1, %c0_2] : memref<1x4x256xf32, #tpu.memory_space<vmem>>, vector<1x4x256xf32>
    %4 = vector.shape_cast %3 : vector<1x4x256xf32> to vector<4x256xf32>
    %c0_3 = arith.constant 0 : index
    %c0_4 = arith.constant 0 : index
    %5 = vector.load %arg8[%c0_3, %c0_4] : memref<4x64xf32, #tpu.memory_space<vmem>>, vector<4x64xf32>
    %c0_5 = arith.constant 0 : index
    %c0_6 = arith.constant 0 : index
    %6 = vector.load %arg3[%c0_5, %c0_6] : memref<256x64xf32, #tpu.memory_space<vmem>>, vector<256x64xf32>
    %cst = arith.constant dense<0.000000e+00> : vector<4x64xf32>
    %7 = tpu.matmul %4, %6, %cst {dimension_numbers = #tpu.dot_dimension_numbers<[1], [0], [0], [1], [0, 0, 1, 1], [], []>} : vector<4x256xf32>, vector<256x64xf32>, vector<4x64xf32> -> vector<4x64xf32>
    %8 = arith.addf %5, %7 : vector<4x64xf32>
    %c0_7 = arith.constant 0 : index
    %c0_8 = arith.constant 0 : index
    %9 = vector.load %arg8[%c0_7, %c0_8] : memref<4x64xf32, #tpu.memory_space<vmem>>, vector<4x64xf32>
    tpu.vector_store %arg8[%c0_7, %c0_8], %8 {strides = array<i32>} : memref<4x64xf32, #tpu.memory_space<vmem>>, vector<4x64xf32>,
    %c0_i32_9 = arith.constant 0 : i32
    %10 = arith.cmpi eq, %arg1, %c0_i32_9 : i32
    %11 = arith.extui %10 : i1 to i32
    %c0_i32_10 = arith.constant 0 : i32
    %12 = arith.cmpi ne, %11, %c0_i32_10 : i32
    scf.if %12 {
      %c0_11 = arith.constant 0 : index
      %c0_12 = arith.constant 0 : index
      %13 = vector.load %arg4[%c0_11, %c0_12] : memref<16x4xf32, #tpu.memory_space<vmem>>, vector<16x4xf32>
      %c0_13 = arith.constant 0 : index
      %c0_14 = arith.constant 0 : index
      %14 = vector.load %arg8[%c0_13, %c0_14] : memref<4x64xf32, #tpu.memory_space<vmem>>, vector<4x64xf32>
      %cst_15 = arith.constant dense<0.000000e+00> : vector<16x64xf32>
      %15 = tpu.matmul %13, %14, %cst_15 {dimension_numbers = #tpu.dot_dimension_numbers<[1], [0], [0], [1], [0, 0, 1, 1], [], []>} : vector<16x4xf32>, vector<4x64xf32>, vector<16x64xf32> -> vector<16x64xf32>
      %c0_16 = arith.constant 0 : index
      %c0_17 = arith.constant 0 : index
      %16 = vector.load %arg5[%c0_16, %c0_17] : memref<16x64xf32, #tpu.memory_space<vmem>>, vector<16x64xf32>
      %17 = arith.addf %15, %16 : vector<16x64xf32>
      %cst_18 = arith.constant 0.000000e+00 : f32
      %18 = vector.broadcast %cst_18 : f32 to vector<16x64xf32>
      %19 = arith.maximumf %17, %18 : vector<16x64xf32>
      %c0_19 = arith.constant 0 : index
      %c0_20 = arith.constant 0 : index
      %20 = vector.load %arg6[%c0_19, %c0_20] : memref<16x64xf32, #tpu.memory_space<vmem>>, vector<16x64xf32>
      %cst_21 = arith.constant 0.000000e+00 : f32
      %21 = vector.broadcast %cst_21 : f32 to vector<16x64xf32>
      %22 = arith.cmpf one, %20, %21 : vector<16x64xf32>
      %cst_22 = arith.constant 0.000000e+00 : f32
      %23 = vector.broadcast %cst_22 : f32 to vector<16x64xf32>
      %24 = arith.select %22, %19, %23 : vector<16x64xi1>, vector<16x64xf32>
      %c0_23 = arith.constant 0 : index
      %c0_24 = arith.constant 0 : index
      %c0_25 = arith.constant 0 : index
      %25 = vector.load %arg7[%c0_23, %c0_24, %c0_25] : memref<1x16x64xf32, #tpu.memory_space<vmem>>, vector<1x16x64xf32>
      %26 = vector.shape_cast %25 : vector<1x16x64xf32> to vector<16x64xf32>
      %27 = vector.shape_cast %24 : vector<16x64xf32> to vector<1x16x64xf32>
      tpu.vector_store %arg7[%c0_23, %c0_24, %c0_25], %27 {strides = array<i32>} : memref<1x16x64xf32, #tpu.memory_space<vmem>>, vector<1x16x64xf32>,
    } else {
    }
    return
  }
  func.func @transform_0(%arg0: i32, %arg1: i32) -> (i32, i32, i32) {
    %c0_i32 = arith.constant 0 : i32
    %c0_i32_0 = arith.constant 0 : i32
    return %arg0, %c0_i32, %arg1 : i32, i32, i32
  }
  func.func @transform_1(%arg0: i32, %arg1: i32) -> (i32, i32) {
    %c0_i32 = arith.constant 0 : i32
    %c0_i32_0 = arith.constant 0 : i32
    return %arg1, %c0_i32 : i32, i32
  }
  func.func @transform_2(%arg0: i32, %arg1: i32) -> (i32, i32) {
    %c0_i32 = arith.constant 0 : i32
    %c0_i32_0 = arith.constant 0 : i32
    %c0_i32_1 = arith.constant 0 : i32
    return %c0_i32, %c0_i32_0 : i32, i32
  }
  func.func @transform_3(%arg0: i32, %arg1: i32) -> (i32, i32) {
    %c0_i32 = arith.constant 0 : i32
    %c0_i32_0 = arith.constant 0 : i32
    %c0_i32_1 = arith.constant 0 : i32
    return %c0_i32, %c0_i32_0 : i32, i32
  }
  func.func @transform_4(%arg0: i32, %arg1: i32) -> (i32, i32) {
    %c0_i32 = arith.constant 0 : i32
    %c0_i32_0 = arith.constant 0 : i32
    %c0_i32_1 = arith.constant 0 : i32
    return %c0_i32, %c0_i32_0 : i32, i32
  }
  func.func @transform_5(%arg0: i32, %arg1: i32) -> (i32, i32, i32) {
    %c0_i32 = arith.constant 0 : i32
    %c0_i32_0 = arith.constant 0 : i32
    %c0_i32_1 = arith.constant 0 : i32
    return %arg0, %c0_i32, %c0_i32_0 : i32, i32, i32
  }
}

</mosaic_0001>

<bundles_post_ra>
// kernel: tpu_custom_call.1
= control target key start
LH: loop header
LB: loop body
LE: loop exit
PB: predicated region body
PF: predicated region fallthrough
CT: control target
= control target key end

     0   :  { %10 = vsyncpa [#allocation4], 0  ;;  %s1095_s0 = inlined_call_operand.vmem [shape: f32[2,4,256], index: 0, kind: input, shape index: {}]   ;;  %s1096_s1 = inlined_call_operand.vmem [shape: f32[256,64], index: 1, kind: input, shape index: {}]   ;;  %s1097_s2 = inlined_call_operand.vmem [shape: f32[16,4], index: 2, kind: input, shape index: {}]   ;;  %s1098_s3 = inlined_call_operand.vmem [shape: f32[16,64], index: 3, kind: input, shape index: {}]   ;;  %s1099_s4 = inlined_call_operand.vmem [shape: f32[16,64], index: 4, kind: input, shape index: {}]   ;;  %s1100_s5 = inlined_call_operand.hbm [shape: f32[2,16,64], index: 5, kind: output, shape index: {}]  }
   0x1   :  { %12 = vsyncpa [#allocation4 + $0x1], 0  ;;  %s866_s18 = smov 0   ;;  %s868_s19 = smov 0  }
   0x2   :  { %s870_s20 = smov 0   ;;  %s872_s21 = smov 0  }
   0x3   :  { %s874_s22 = smov 0   ;;  %s876_s23 = smov 0  }
   0x4 LB: > { %s599_s24 = sadd.s32 4294967295, %s830_s23   ;;  %s600_s25 = sadd.s32 4294967294, %s830_s23   ;;  %s830_s23 = sphi %s876_s23, %s18_s23   ;;  %s826_s22 = sphi %s874_s22, %s1107_s22   ;;  %s822_s21 = sphi %s872_s21, %s1106_s21   ;;  %s818_s20 = sphi %s870_s20, %s1105_s20   ;;  %s814_s19 = sphi %s868_s19, %s1104_s19   ;;  %s810_s18 = sphi %s866_s18, %s1103_s18  }
   0x5   : > { %s30_s26 = sadd.s32 1, %s826_s22  ;;  %s154_s27 = sadd.s32 1, %s818_s20 }
   0x6   : > { %p32_p0 = scmp.ge.s32.totalorder %s30_s26, 2  ;;  %p164_p1 = scmp.ne.s32.totalorder %s818_s20, %s814_s19 }
   0x7   : > { %p165_p2 = scmp.eq.s32.totalorder %s599_s24, 1  ;;  %p170_p3 = scmp.ne.s32.totalorder %s814_s19, %s810_s18 }
   0x8   : > { %s1109_s26 = smov (%p32_p0, %s30_s26), 0  ;;  %p171_p5 = scmp.eq.s32.totalorder %s600_s25, 1 }
   0x9   : > { %p906_p4 = por %p165_p2, %p164_p1  ;;  %s151_s29 = ssub.s32 %s826_s22, %s1109_s26 }
   0xa   : > { %p604_p6 = scmp.ge.s32.totalorder %s830_s23, 1  ;;  %p152_p7 = scmp.eq.s32.totalorder %s151_s29, 0 }
   0xb   : > { %p913_p8 = por %p171_p5, %p170_p3  ;;  %p220_p9 = scmp.lt.s32.totalorder %s830_s23, 3 }
   0xc   : > { %s919_s6 = scalar_select %p152_p7, %s818_s20, %s154_s27  }
   0xd   : > { %p221_p10 = pnand %p604_p6, %p220_p9 }
   0xe   : > { %v297_v0 = vld [vmem:[%s1096_s1 + $0x80] sm:$0xff] (!%p221_p10)  ;;  %v298_v1 = vld [vmem:[%s1096_s1 + $0x88] sm:$0xff] (!%p221_p10)  ;;  %p258_p11 = scmp.lt.s32.totalorder (!%p221_p10), %s822_s21, 1  ;;  %v299_v5 = vld [vmem:[%s1096_s1 + $0x90] sm:$0xff] (!%p221_p10)  ;;  %vm277_vm0 = vcmask (!%p221_p10), 519168   ;;  %v832_v50 = vmov (!%p221_p10), 0.0  }
   0xf   : > { %224 = sbr.rel (%p221_p10) target bundleno = 509 (0x1fd), region = 40  ;;  %v281_v2 = vld [vmem:[%s1096_s1] sm:$0xff] (!%p221_p10)  ;;  %v661_v3 = vpack.c.bf16 (!%p221_p10), %v298_v1, %v297_v0  ;;  %v282_v4 = vld [vmem:[%s1096_s1 + $0x8] sm:$0xff] (!%p221_p10)  ;;  %v300_v6 = vld [vmem:[%s1096_s1 + $0x98] sm:$0xff] (!%p221_p10)  ;;  %278 = vst.msk [vmem:[#allocation2] sm:$0xf] (!%p221_p10), %vm277_vm0, %v832_v50 }
  0x10   : > { %v663_v7 = vpack.c.bf16 (!%p221_p10), %v282_v4, %v281_v2  ;;  %v665_v8 = vpack.c.bf16 (!%p221_p10), %v300_v6, %v299_v5  ;;  %v283_v9 = vld [vmem:[%s1096_s1 + $0x10] sm:$0xff] (!%p221_p10)  ;;  %v284_v10 = vld [vmem:[%s1096_s1 + $0x18] sm:$0xff] (!%p221_p10)  ;;  %v301_v11 = vld [vmem:[%s1096_s1 + $0xa0] sm:$0xff] (!%p221_p10)  ;;  %vm397_vm1 = vcmask (!%p221_p10), 31744   ;;  %vm404_vm2 = vcmask (!%p221_p10), 1043456   ;;  %s254_s27 = sand.u32 (!%p221_p10), 1, %s814_s19  }
  0x11   : > { %662 = vmatprep.subr.bf16.mxu0 (!%p221_p10), %v661_v3  ;;  %v302_v12 = vld [vmem:[%s1096_s1 + $0xa8] sm:$0xff] (!%p221_p10)  ;;  %v667_v13 = vpack.c.bf16 (!%p221_p10), %v284_v10, %v283_v9  ;;  %v285_v15 = vld [vmem:[%s1096_s1 + $0x20] sm:$0xff] (!%p221_p10)  ;;  %v303_v17 = vld [vmem:[%s1096_s1 + $0xb0] sm:$0xff] (!%p221_p10)  ;;  %s605_s29 = sshll.u32 (!%p221_p10), %s254_s27, 4  ;;  %s617_s24 = sshll.u32 (!%p221_p10), %s822_s21, 8  ;;  %vm491_vm4 = vcmask (!%p221_p10), 523264  }
  0x12   : > { %664 = vmatpush3.bf16.msra.mxu0 (!%p221_p10), %v663_v7  ;;  %v669_v14 = vpack.c.bf16 (!%p221_p10), %v302_v12, %v301_v11  ;;  %v286_v16 = vld [vmem:[%s1096_s1 + $0x28] sm:$0xff] (!%p221_p10)  ;;  %v304_v18 = vld [vmem:[%s1096_s1 + $0xb8] sm:$0xff] (!%p221_p10)  ;;  %v287_v21 = vld [vmem:[%s1096_s1 + $0x30] sm:$0xff] (!%p221_p10)  ;;  %s256_s16 = scalar_lea.vmem (!%p221_p10), [#allocation3], %s605_s29  ;;  %s1047_s7 = scalar_lea.hbm (!%p221_p10), %s1100_s5, %s617_s24 }
  0x13   : > { %666 = vmatprep.subr.bf16.mxu0 (!%p221_p10), %v665_v8  ;;  %v671_v19 = vpack.c.bf16 (!%p221_p10), %v286_v16, %v285_v15  ;;  %v673_v20 = vpack.c.bf16 (!%p221_p10), %v304_v18, %v303_v17  ;;  %v288_v22 = vld [vmem:[%s1096_s1 + $0x38] sm:$0xff] (!%p221_p10)  ;;  %v305_v23 = vld [vmem:[%s1096_s1 + $0xc0] sm:$0xff] (!%p221_p10)  ;;  %v306_v24 = vld [vmem:[%s1096_s1 + $0xc8] sm:$0xff] (!%p221_p10)  ;;  %s508_s17 = sshll.u32 (!%p221_p10), %s256_s16, 4  ;;  %s833_s8 = smov (!%p221_p10), [#allocation3]   ;;  %s1042_s17 = int_to_ptr.vmem [resolvable:$true] %s508_s17 }
  0x14   : > { %v675_v27 = vpack.c.bf16 (!%p221_p10), %v288_v22, %v287_v21  ;;  %v677_v28 = vpack.c.bf16 (!%p221_p10), %v306_v24, %v305_v23  ;;  %v289_v29 = vld [vmem:[%s1096_s1 + $0x40] sm:$0xff] (!%p221_p10)  ;;  %v290_v30 = vld [vmem:[%s1096_s1 + $0x48] sm:$0xff] (!%p221_p10)  ;;  %v307_v31 = vld [vmem:[%s1096_s1 + $0xd0] sm:$0xff] (!%p221_p10)  ;;  %s752_s29 = scalar_lea.vmem (!%p221_p10), %s1042_s17, 256 }
  0x15   : > { %v308_v32 = vld [vmem:[%s1096_s1 + $0xd8] sm:$0xff] (!%p221_p10)  ;;  %v679_v33 = vpack.c.bf16 (!%p221_p10), %v290_v30, %v289_v29  ;;  %v291_v35 = vld [vmem:[%s1096_s1 + $0x50] sm:$0xff] (!%p221_p10)  ;;  %v309_v37 = vld [vmem:[%s1096_s1 + $0xe0] sm:$0xff] (!%p221_p10)  ;;  %p753_p12 = scmp.ne.s32.totalorder (!%p221_p10), %s1042_s17, %s752_s29 }
  0x16   : > { %s259_s10 = scalar_select %p258_p11, %s822_s21, 1  ;;  %668 = vmatpush3.bf16.msra.mxu0 %v667_v13  ;;  %v681_v34 = vpack.c.bf16 %v308_v32, %v307_v31  ;;  %v292_v36 = vld [vmem:[%s1096_s1 + $0x58] sm:$0xff]  ;;  %v310_v38 = vld [vmem:[%s1096_s1 + $0xe8] sm:$0xff]  ;;  %v293_v41 = vld [vmem:[%s1096_s1 + $0x60] sm:$0xff] }
  0x17   : > { %670 = vmatprep.subr.bf16.mxu0 %v669_v14  ;;  %v683_v39 = vpack.c.bf16 %v292_v36, %v291_v35  ;;  %v685_v40 = vpack.c.bf16 %v310_v38, %v309_v37  ;;  %v294_v42 = vld [vmem:[%s1096_s1 + $0x68] sm:$0xff]  ;;  %v311_v43 = vld [vmem:[%s1096_s1 + $0xf0] sm:$0xff]  ;;  %v312_v44 = vld [vmem:[%s1096_s1 + $0xf8] sm:$0xff]  ;;  %s1049_s21 = scalar_lea.sflag [#allocation4], %s254_s27  ;;  %p754_p13 = pnand %p753_p12, %p906_p4 }
  0x18   : > { %s616_s13 = sshll.u32 %s259_s10, 3  ;;  %v687_v45 = vpack.c.bf16 %v294_v42, %v293_v41  ;;  %v689_v46 = vpack.c.bf16 %v312_v44, %v311_v43  ;;  %v295_v47 = vld [vmem:[%s1096_s1 + $0x70] sm:$0xff]  ;;  %v296_v48 = vld [vmem:[%s1096_s1 + $0x78] sm:$0xff]  ;;  %v392_v51 = vld [vmem:[%s1097_s2] sm:$0xff]  ;;  %s756_s10 = sshll.u32 %s833_s8, 4  ;;  %s757_s10 = int_to_ptr.vmem [resolvable:$false] %s756_s10 }
  0x19   : > { %s265_s9 = scalar_lea.vmem %s1095_s0, %s616_s13  ;;  %v691_v49 = vpack.c.bf16 %v296_v48, %v295_v47  ;;  %658 = vmatprep.mubr.msk.f32.mxu1 %vm397_vm1, %v392_v51  ;;  %v280_v53 = vld [vmem:[#allocation2] sm:$0xf]  ;;  %v393_v58 = vld [vmem:[%s1097_s2 + $0x8] sm:$0xff]  ;;  %p755_p0 = pneg %p754_p13 }
  0x1a   : > { %v279_v25 = vld [vmem:[%s265_s9] sm:$0xff]  ;;  %672 = vmatpush3.bf16.msra.mxu0 %v671_v19  ;;  %v396_v59 = vld [vmem:[%s1098_s3 + $0x8] sm:$0xff]  ;;  %s758_s9 = scalar_lea.vmem %s757_s10, 512  ;;  %p759_p1 = scmp.lt.s32.totalorder %s1042_s17, %s757_s10 }
  0x1b   : > { %v314_v26 = vcombine.high %v279_v25, %v279_v25  ;;  %674 = vmatprep.subr.bf16.mxu0 %v673_v20  ;;  %v486_v60 = vld [vmem:[%s1099_s4 + $0x8] sm:$0xff]  ;;  %v395_v61 = vld [vmem:[%s1098_s3] sm:$0xff]  ;;  %p760_p2 = scmp.lt.s32.totalorder %s758_s9, %s752_s29 }
  0x1c   : > { %v485_v63 = vld [vmem:[%s1099_s4] sm:$0xff]  ;;  %vm488_vm3 = vcmp.ne.f32.partialorder %v486_v60, 0.0 }
  0x1d   : > { %380 = vmatprep.mubr.f32.mxu0 %v314_v26  ;;  %vm487_vm5 = vcmp.ne.f32.partialorder %v485_v63, 0.0  ;;  %p761_p3 = por %p760_p2, %p759_p1 }
  0x1e   : > { %676 = vmatpush3.bf16.msra.mxu0 %v675_v27 }
  0x1f   : > { %678 = vmatprep.subr.bf16.mxu0 %v677_v28  ;;  %p762_p5 = pnand %p761_p3, %p755_p0 }
  0x22   : > { %680 = vmatpush3.bf16.msra.mxu0 %v679_v33 }
  0x23   : > { %682 = vmatprep.subr.bf16.mxu0 %v681_v34 }
  0x26   : > { %684 = vmatpush3.bf16.msra.mxu0 %v683_v39 }
  0x27   : > { %686 = vmatprep.subr.bf16.mxu0 %v685_v40 }
  0x2a   : > { %688 = vmatpush3.bf16.msra.mxu0 %v687_v45 }
  0x2b   : > { %690 = vmatprep.subr.bf16.mxu0 %v689_v46 }
  0x2e   : > { %692 = vmatpush3.bf16.msra.mxu0 %v691_v49 }
  0x31   : > { %381 = vmatmul.mubr.f32.vlgmr.msra.gmra.mrb[0].mxu0 %v279_v25 }
 0x104   : > { %v650_v52 = vpop.f32.mrb[0].mxu0 }
 0x105   : > { %v651_v54 = vpop.f32.mrb[1].mxu0 }
 0x106   : > { %v652_v55 = vadd.f32 %v651_v54, %v650_v52 }
 0x108   : > { %v386_v56 = vadd.f32 %v652_v55, %v280_v53 }
 0x10a   : > { %388 = vst.msk [vmem:[#allocation2] sm:$0xf] %vm277_vm0, %v386_v56 }
 0x111   : > { %v394_v57 = vld [vmem:[#allocation2] sm:$0xf] }
 0x112   : > { %656 = vmatprep.subr.msk.mxu1 %vm404_vm2, %v394_v57 }
 0x113   : > { %657 = vmatpush3.msk.msra.mxu1 %vm404_vm2, %v394_v57 }
 0x114   : > { %659 = vmatmul.mubr.msk.f32.vlgmr.msra.gmra.mrb[0].mxu1 %vm397_vm1, %v393_v58 }
 0x1e7   : > { %v660_v62 = vpop.f32.mrb[0].mxu1 }
 0x1e8   : > { %v480_v0 = vadd.f32 %v660_v62, %v396_v59  ;;  %v474_v1 = vpop.f32.mrb[1].mxu1 }
 0x1e9   : > { %v475_v2 = vadd.f32 %v474_v1, %v395_v61 }
 0x1ea   : > { %v484_v3 = vmax.f32 %v480_v0, 0.0 }
 0x1eb   : > { %v483_v4 = vmax.f32 %v475_v2, 0.0 }
 0x1ec   : > { %v490_v5 = vsel %vm488_vm3, %v484_v3, 0.0 }
 0x1ed   : > { %493 = vst.msk [vmem:[%s256_s16 + $0x8] sm:$0xff] %vm491_vm4, %v490_v5  ;;  %v489_v6 = vsel %vm487_vm5, %v483_v4, 0.0 }
 0x1ee   : > { %492 = vst.msk [vmem:[%s256_s16] sm:$0xff] %vm491_vm4, %v489_v6 }
 0x1ef   : > { %765 = shalt.err (!%p762_p5)
}
 0x1f0   : > { %s766_s27 = scalar_lea.hbm %s1047_s7, 256  ;;  %s770_s14 = scalar_lea.hbm %s1100_s5, 512 }
 0x1f1   : > { %p767_p6 = scmp.ne.s32.totalorder %s1047_s7, %s766_s27  ;;  %p771_p10 = scmp.lt.u32.totalorder %s1047_s7, %s1100_s5 }
 0x1f2   : > { %p772_p11 = scmp.lt.u32.totalorder %s770_s14, %s766_s27  ;;  %p774_p13 = scmp.lt.u32.totalorder %s766_s27, %s1047_s7 }
 0x1f3   : > { %p768_p7 = pnand %p767_p6, %p906_p4 }
 0x1f4   : > { %p773_p12 = por %p772_p11, %p771_p10 }
 0x1f5   : > { %p769_p9 = pneg %p768_p7 }
 0x1f6   : > { %p775_p0 = por %p774_p13, %p773_p12 }
 0x1f8   : > { %p776_p1 = pnand %p775_p0, %p769_p9 }
 0x1fa   : > { %779 = shalt.err (!%p776_p1)
}
 0x1fb   : > { %s834_s24 = smov 128   ;;  %s835_s13 = smov 8  }
 0x1fc   : > { %693 = dma.vmem_to_hbm [thread:$0]  (%p906_p4), %s1042_s17, 256, %s1047_s7, %s1049_s21, %s834_s24, %s834_s24, %s835_s13  }
 0x1fd PF: > { %p699_p2 = scmp.ge.s32.totalorder %s830_s23, 2  ;;  %s523_s25 = sand.u32 1, %s810_s18  }
 0x1fe   : > { %s524_s29 = scalar_lea.sflag [#allocation4], %s523_s25 }
 0x1ff   : > { %p696_p3 = pnand %p699_p2, %p913_p8 }
 0x201   : > { %805 = dma.done.wait (!%p696_p3), %s524_s29, 256  }
 0x202   : > { %807 = vsyncadd (!%p696_p3), %s524_s29, 4294967040  ;;  %s18_s23 = sadd.s32 1, %s830_s23   ;;  %s1103_s18 = smov %s814_s19 }
 0x203   : > { %p15_p5 = scmp.ge.s32.totalorder %s18_s23, 4   ;;  %s1104_s19 = smov %s818_s20 }
 0x204   : > { %s1105_s20 = smov %s919_s6  ;;  %s1106_s21 = smov %s826_s22 }
 0x205   : > { %s1107_s22 = smov %s1109_s26  ;;  %17 = sbr.rel (!%p15_p5) target bundleno = 4 (0x4), region = 86 }
 0x20c   :  { %529 = vsyncpa [#allocation4], 1 }
 0x20d   :  { %531 = vsyncpa [#allocation4 + $0x1], 1 }

</bundles_post_ra>
